<compile_context>
chip_gen: v6e
topology: v6e:2x2x1
jax: 0.10.0
libtpu: 0.0.40
codegen_flags: <defaults>
</compile_context>

<pallas_src>
import math
import functools

import jax
import jax.numpy as jnp
import numpy as np
from jax.experimental import pallas as pl
from jax.experimental.pallas import tpu as pltpu


def _round_up(x, m):
    return ((x + m - 1) // m) * m


def _conv_stats_kernel(x_ref, w_ref, conv_ref, stats_ref, *, tm, m_total):
    """One MXU contraction per M-block + fused per-block BN partial stats.

    x_ref:     (TM, K*D) bf16  im2col rows for this block
    w_ref:     (K*D, F)  bf16  flattened conv weight (same block every step)
    conv_ref:  (TM, F)   f32   conv output block
    stats_ref: (1, 2, F) f32   row 0 = sum, row 1 = sum of squares (tail-masked)
    """
    acc = jnp.dot(x_ref[...], w_ref[...], preferred_element_type=jnp.float32)
    conv_ref[...] = acc

    # mask rows that belong to the padded tail of the flattened (N*L) axis
    row = pl.program_id(0) * tm + jax.lax.broadcasted_iota(jnp.int32, acc.shape, 0)
    acc_m = jnp.where(row < m_total, acc, 0.0)
    s = jnp.sum(acc_m, axis=0, keepdims=True)            # (1, F)
    sq = jnp.sum(acc_m * acc_m, axis=0, keepdims=True)   # (1, F)
    stats_ref[...] = jnp.concatenate([s, sq], axis=0).reshape(1, 2, -1)


def _bn_lrelu_kernel(x_ref, scale_ref, shift_ref, o_ref):
    """Folded BN affine (y = x*scale + shift) + LeakyReLU(0.2), all f32 VPU."""
    y = x_ref[...] * scale_ref[...] + shift_ref[...]
    o_ref[...] = jnp.where(y >= 0.0, y, 0.2 * y)


def c1d_forward(x, conv_w, gamma, beta, *, block_m=128):
    """x: (N, L, D) f32.  conv_w: (F, D, K) (PyTorch Conv1d weight layout).
    Returns (N, L, F) f32, matching c1D.forward (training-mode BatchNorm)."""
    N, L, D = x.shape
    F_, D_w, K = conv_w.shape
    assert D_w == D
    pad = math.ceil((K - 1) / 2)
    M = N * L
    KD = K * D

    # ---- wrapper-side layout plumbing: zero-pad + im2col -> (M, K*D)
    x = x.astype(jnp.float32)
    x_pad = jnp.pad(x, ((0, 0), (pad, pad), (0, 0)))
    # computing only output positions 0..L-1 also implements the even-K
    # "cut last element" behaviour of the module
    cols = jnp.concatenate([x_pad[:, k:k + L, :] for k in range(K)], axis=-1)
    xcol = cols.reshape(M, KD).astype(jnp.bfloat16)
    w2 = jnp.transpose(conv_w.astype(jnp.float32), (2, 1, 0)).reshape(KD, F_)
    w2 = w2.astype(jnp.bfloat16)

    tm = min(block_m, _round_up(M, 8))
    m_pad = _round_up(M, tm)
    nb = m_pad // tm
    if m_pad != M:
        xcol = jnp.pad(xcol, ((0, m_pad - M), (0, 0)))

    # ---- pass 1: conv (single big matmul per block) + fused BN partial stats
    conv_out, stats = pl.pallas_call(
        functools.partial(_conv_stats_kernel, tm=tm, m_total=M),
        out_shape=(
            jax.ShapeDtypeStruct((m_pad, F_), jnp.float32),
            jax.ShapeDtypeStruct((nb, 2, F_), jnp.float32),
        ),
        grid=(nb,),
        in_specs=[
            pl.BlockSpec((tm, KD), lambda m: (m, 0)),
            pl.BlockSpec((KD, F_), lambda m: (0, 0)),
        ],
        out_specs=(
            pl.BlockSpec((tm, F_), lambda m: (m, 0)),
            pl.BlockSpec((1, 2, F_), lambda m: (m, 0, 0)),
        ),
        compiler_params=pltpu.CompilerParams(
            dimension_semantics=("parallel",)),
    )(xcol, w2)

    # ---- tiny cross-block reduction + fold BN into a single affine (XLA glue)
    ssum = jnp.sum(stats[:, 0, :], axis=0)
    ssq = jnp.sum(stats[:, 1, :], axis=0)
    mean = ssum / M
    var = jnp.maximum(ssq / M - mean * mean, 0.0)   # biased train-mode variance
    inv = jax.lax.rsqrt(var + 1e-5)
    g = gamma.astype(jnp.float32)
    b = beta.astype(jnp.float32)
    scale = (g * inv).reshape(1, F_)
    shift = (b - mean * g * inv).reshape(1, F_)

    # ---- pass 2: normalize + affine + LeakyReLU(0.2)
    y = pl.pallas_call(
        _bn_lrelu_kernel,
        out_shape=jax.ShapeDtypeStruct((m_pad, F_), jnp.float32),
        grid=(nb,),
        in_specs=[
            pl.BlockSpec((tm, F_), lambda m: (m, 0)),
            pl.BlockSpec((1, F_), lambda m: (0, 0)),
            pl.BlockSpec((1, F_), lambda m: (0, 0)),
        ],
        out_specs=pl.BlockSpec((tm, F_), lambda m: (m, 0)),
        compiler_params=pltpu.CompilerParams(
            dimension_semantics=("parallel",)),
    )(conv_out, scale, shift)

    return y[:M].reshape(N, L, F_)


def c1d_reference(x, conv_w, gamma, beta):
    """Pure-JAX f32 reference mirroring the PyTorch module exactly."""
    K = conv_w.shape[2]
    pad = math.ceil((K - 1) / 2)
    xin = jnp.transpose(x, (0, 2, 1))  # (N, D, L) == x.permute(0, 2, 1)
    out = jax.lax.conv_general_dilated(
        xin, conv_w, window_strides=(1,), padding=[(pad, pad)],
        dimension_numbers=("NCH", "OIH", "NCH"),
        precision=jax.lax.Precision.HIGHEST,
    )
    if K % 2 == 0:
        out = out[:, :, :-1]
    mean = jnp.mean(out, axis=(0, 2), keepdims=True)
    var = jnp.mean((out - mean) ** 2, axis=(0, 2), keepdims=True)
    y = (out - mean) * jax.lax.rsqrt(var + 1e-5)
    y = y * gamma.reshape(1, -1, 1) + beta.reshape(1, -1, 1)
    y = jnp.where(y >= 0.0, y, 0.2 * y)
    return jnp.transpose(y, (0, 2, 1))  # (N, L, F)


if __name__ == "__main__":
    def run_case(N, L, D, F_, K, key):
        kx, kw, kg, kb = jax.random.split(key, 4)
        x = jax.random.normal(kx, (N, L, D), dtype=jnp.float32)
        bound = 1.0 / math.sqrt(D * K)
        conv_w = jax.random.uniform(kw, (F_, D, K), minval=-bound,
                                    maxval=bound, dtype=jnp.float32)
        gamma = 1.0 + 0.1 * jax.random.normal(kg, (F_,), dtype=jnp.float32)
        beta = 0.1 * jax.random.normal(kb, (F_,), dtype=jnp.float32)

        out = jax.block_until_ready(c1d_forward(x, conv_w, gamma, beta))
        ref = jax.block_until_ready(c1d_reference(x, conv_w, gamma, beta))
        # bf16 MXU operands (f32 accumulation) vs f32-HIGHEST reference
        np.testing.assert_allclose(np.asarray(out), np.asarray(ref),
                                   rtol=2e-2, atol=2e-2)

    key = jax.random.PRNGKey(0)
    k1, k2 = jax.random.split(key)
    run_case(8, 32, 64, 128, 3, k1)   # odd K, lane-dense F=128, 2-block grid
    run_case(3, 16, 24, 48, 2, k2)    # even K (cut-last path), non-128 F
    print("KERNEL_OK")
</pallas_src>

<mosaic_0001>
module attributes {stable_mosaic.version = 11 : i64} {
  func.func @_conv_stats_kernel(%arg0: i32, %arg1: memref<128x192xbf16, #tpu.memory_space<vmem>>, %arg2: memref<192x128xbf16, #tpu.memory_space<vmem>>, %arg3: memref<128x128xf32, #tpu.memory_space<vmem>>, %arg4: memref<1x2x128xf32, #tpu.memory_space<vmem>>) attributes {dimension_semantics = [#tpu.dimension_semantics<parallel>], iteration_bounds = array<i64: 2>, scalar_prefetch = 0 : i64, scratch_operands = 0 : i64, tpu.core_type = #tpu.core_type<tc>, window_params = [{transform_indices = @transform_0, window_bounds = array<i64: 128, 192>}, {pipeline_mode = #tpu.pipeline_mode<synchronous>, transform_indices = @transform_1, window_bounds = array<i64: 192, 128>}, {transform_indices = @transform_2, window_bounds = array<i64: 128, 128>}, {transform_indices = @transform_3, window_bounds = array<i64: 1, 2, 128>}]} {
    %c0 = arith.constant 0 : index
    %c0_0 = arith.constant 0 : index
    %0 = vector.load %arg1[%c0, %c0_0] : memref<128x192xbf16, #tpu.memory_space<vmem>>, vector<128x192xbf16>
    %c0_1 = arith.constant 0 : index
    %c0_2 = arith.constant 0 : index
    %1 = vector.load %arg2[%c0_1, %c0_2] : memref<192x128xbf16, #tpu.memory_space<vmem>>, vector<192x128xbf16>
    %cst = arith.constant dense<0.000000e+00> : vector<128x128xf32>
    %2 = tpu.matmul %0, %1, %cst {dimension_numbers = #tpu.dot_dimension_numbers<[1], [0], [0], [1], [0, 0, 1, 1], [], []>} : vector<128x192xbf16>, vector<192x128xbf16>, vector<128x128xf32> -> vector<128x128xf32>
    %c0_3 = arith.constant 0 : index
    %c0_4 = arith.constant 0 : index
    %3 = vector.load %arg3[%c0_3, %c0_4] : memref<128x128xf32, #tpu.memory_space<vmem>>, vector<128x128xf32>
    tpu.vector_store %arg3[%c0_3, %c0_4], %2 {strides = array<i32>} : memref<128x128xf32, #tpu.memory_space<vmem>>, vector<128x128xf32>,
    %c128_i32 = arith.constant 128 : i32
    %4 = arith.muli %arg0, %c128_i32 : i32
    %5 = tpu.iota {dimensions = array<i32: 0>} : vector<128x128xi32>
    %6 = vector.broadcast %4 : i32 to vector<128x128xi32>
    %7 = arith.addi %6, %5 : vector<128x128xi32>
    %c256_i32 = arith.constant 256 : i32
    %8 = vector.broadcast %c256_i32 : i32 to vector<128x128xi32>
    %9 = arith.cmpi slt, %7, %8 : vector<128x128xi32>
    %cst_5 = arith.constant 0.000000e+00 : f32
    %10 = vector.broadcast %cst_5 : f32 to vector<128x128xf32>
    %11 = arith.select %9, %2, %10 : vector<128x128xi1>, vector<128x128xf32>
    %cst_6 = arith.constant dense<0.000000e+00> : vector<128xf32>
    %12 = vector.multi_reduction <add>, %11, %cst_6 [0] : vector<128x128xf32> to vector<128xf32>
    %13 = vector.shape_cast %12 : vector<128xf32> to vector<1x128xf32>
    %14 = arith.mulf %11, %11 : vector<128x128xf32>
    %cst_7 = arith.constant dense<0.000000e+00> : vector<128xf32>
    %15 = vector.multi_reduction <add>, %14, %cst_7 [0] : vector<128x128xf32> to vector<128xf32>
    %16 = vector.shape_cast %15 : vector<128xf32> to vector<1x128xf32>
    %17 = tpu.concatenate %13, %16 in 0 : vector<1x128xf32>, vector<1x128xf32> -> vector<2x128xf32>
    %18 = vector.shape_cast %17 : vector<2x128xf32> to vector<1x2x128xf32>
    %c0_8 = arith.constant 0 : index
    %c0_9 = arith.constant 0 : index
    %c0_10 = arith.constant 0 : index
    %19 = vector.load %arg4[%c0_8, %c0_9, %c0_10] : memref<1x2x128xf32, #tpu.memory_space<vmem>>, vector<1x2x128xf32>
    tpu.vector_store %arg4[%c0_8, %c0_9, %c0_10], %18 {strides = array<i32>} : memref<1x2x128xf32, #tpu.memory_space<vmem>>, vector<1x2x128xf32>,
    return
  }
  func.func @transform_0(%arg0: i32) -> (i32, i32) {
    %c0_i32 = arith.constant 0 : i32
    %c0_i32_0 = arith.constant 0 : i32
    return %arg0, %c0_i32 : i32, i32
  }
  func.func @transform_1(%arg0: i32) -> (i32, i32) {
    %c0_i32 = arith.constant 0 : i32
    %c0_i32_0 = arith.constant 0 : i32
    %c0_i32_1 = arith.constant 0 : i32
    return %c0_i32, %c0_i32_0 : i32, i32
  }
  func.func @transform_2(%arg0: i32) -> (i32, i32) {
    %c0_i32 = arith.constant 0 : i32
    %c0_i32_0 = arith.constant 0 : i32
    return %arg0, %c0_i32 : i32, i32
  }
  func.func @transform_3(%arg0: i32) -> (i32, i32, i32) {
    %c0_i32 = arith.constant 0 : i32
    %c0_i32_0 = arith.constant 0 : i32
    %c0_i32_1 = arith.constant 0 : i32
    return %arg0, %c0_i32, %c0_i32_0 : i32, i32, i32
  }
}

</mosaic_0001>

<bundles_post_ra>
// kernel: tpu_custom_call.1
= control target key start
LH: loop header
LB: loop body
LE: loop exit
PB: predicated region body
PF: predicated region fallthrough
CT: control target
= control target key end

     0   :  { %9 = vsyncpa [#allocation3], 0  ;;  %s1357_s0 = inlined_call_operand.vmem [shape: bf16[256,192], index: 0, kind: input, shape index: {}]   ;;  %s1358_s1 = inlined_call_operand.vmem [shape: bf16[192,128], index: 1, kind: input, shape index: {}]   ;;  %s1359_s2 = inlined_call_operand.hbm [shape: f32[256,128], index: 2, kind: output, shape index: {0}]   ;;  %s1360_s3 = inlined_call_operand.hbm [shape: f32[2,2,128], index: 3, kind: output, shape index: {1}]  }
   0x1   :  { %11 = vsyncpa [#allocation3 + $0x1], 0 }
   0x2   :  { %12 = vsyncpa [#allocation5], 0 }
   0x3   :  { %14 = vsyncpa [#allocation5 + $0x1], 0  ;;  %s1042_s12 = smov 0   ;;  %s1044_s13 = smov 0  }
   0x4   :  { %s1046_s14 = smov 0   ;;  %s1048_s15 = smov 0  }
   0x5 LB: > { %s1063_s16 = sadd.s32 4294967295, %s1015_s15   ;;  %s763_s17 = sadd.s32 4294967294, %s1015_s15   ;;  %s1015_s15 = sphi %s1048_s15, %s1366_s15   ;;  %s1011_s14 = sphi %s1046_s14, %s1365_s14   ;;  %s1007_s13 = sphi %s1044_s13, %s1364_s13   ;;  %s1003_s12 = sphi %s1042_s12, %s1363_s12  }
   0x6   : > { %s1067_s18 = sadd.s32 1, %s1015_s15   ;;  %s74_s19 = sadd.s32 1, %s1011_s14 }
   0x7   : > { %s71_s20 = ssub.s32 %s1015_s15, %s1067_s18  ;;  %p84_p0 = scmp.ne.s32.totalorder %s1011_s14, %s1007_s13 }
   0x8   : > { %p72_p1 = scmp.eq.s32.totalorder %s71_s20, 0  ;;  %p85_p2 = scmp.eq.s32.totalorder %s1063_s16, 1 }
   0x9   : > { %p90_p3 = scmp.ne.s32.totalorder %s1007_s13, %s1003_s12  ;;  %p91_p4 = scmp.eq.s32.totalorder %s763_s17, 1 }
   0xa   : > { %s1078_s21 = scalar_select %p72_p1, %s1011_s14, %s74_s19  }
   0xb   : > { %p1080_p5 = por %p85_p2, %p84_p0  ;;  %p1084_p6 = por %p91_p4, %p90_p3 }
   0xc   : > { %p766_p7 = scmp.ge.s32.totalorder %s1015_s15, 1  ;;  %p148_p8 = scmp.lt.s32.totalorder %s1015_s15, 3 }
   0xe   : > { %p149_p9 = pnand %p766_p7, %p148_p8 }
   0xf   : > { %s769_s26 = sshll.u32 (!%p149_p9), %s1063_s16, 4  ;;  %s1181_s8 = sand.u32 (!%p149_p9), 1, %s1007_s13  }
  0x10   : > { %152 = sbr.rel (%p149_p9) target bundleno = 349 (0x15d), region = 28  ;;  %p179_p10 = scmp.lt.s32.totalorder (!%p149_p9), %s769_s26, 31 }
  0x11   : > { %s767_s10 = sshll.u32 (!%p149_p9), %s1181_s8, 7  ;;  %s817_s17 = sshll.u32 (!%p149_p9), %s1063_s16, 11 }
  0x12   : > { %s1188_s11 = scalar_lea.vmem (!%p149_p9), [#allocation2], %s767_s10  ;;  %s1261_s25 = scalar_lea.hbm (!%p149_p9), %s1359_s2, %s817_s17 }
  0x13   : > { %s656_s19 = sshll.u32 (!%p149_p9), %s1188_s11, 4  ;;  %s1018_s28 = smov (!%p149_p9), [#allocation2]   ;;  %s1263_s19 = int_to_ptr.vmem [resolvable:$true] %s656_s19 }
  0x14   : > { %s925_s27 = scalar_lea.vmem (!%p149_p9), %s1263_s19, 2048  ;;  %s929_s29 = sshll.u32 (!%p149_p9), %s1018_s28, 4  ;;  %s930_s29 = int_to_ptr.vmem [resolvable:$false] %s929_s29 }
  0x15   : > { %v889_v0 = vld [vmem:[%s1358_s1 + $0x38] sm:$0xff]   ;;  %v1017_v1 = vmov 0   ;;  %v890_v2 = vld [vmem:[%s1358_s1 + $0x30] sm:$0xff]   ;;  %s1368_s26 = smov (!%p179_p10, %s769_s26), 31  ;;  %v891_v3 = vld [vmem:[%s1358_s1 + $0x28] sm:$0xff]   ;;  %vm371_vm0 = vcmask 523264   ;;  %v510_v29 = vlaneseq  ;;  %p926_p11 = scmp.ne.s32.totalorder %s1263_s19, %s925_s27 }
  0x16   : > { %396 = vmatprep.subr.bf16.mxu0 %v1017_v1  ;;  %818 = vmatprep.subr.bf16.mxu1 %v1017_v1  ;;  %s816_s4 = sshll.u32 %s1368_s26, 3  ;;  %v892_v4 = vld [vmem:[%s1358_s1 + $0x20] sm:$0xff]   ;;  %v893_v6 = vld [vmem:[%s1358_s1 + $0x18] sm:$0xff]   ;;  %v894_v8 = vld [vmem:[%s1358_s1 + $0x10] sm:$0xff]   ;;  %s638_s26 = scalar_lea.sflag [#allocation3], %s1181_s8 }
  0x17   : > { %397 = vmatpush1.bf16.msra.mxu0 %v889_v0  ;;  %830 = vmatpush1.bf16.msra.mxu1 %v889_v0  ;;  %s1112_s9 = scalar_lea.vmem %s1357_s0, %s816_s4  ;;  %v895_v9 = vld [vmem:[%s1358_s1 + $0x8] sm:$0xff]   ;;  %v896_v10 = vld [vmem:[%s1358_s1] sm:$0xff]   ;;  %v897_v11 = vld [vmem:[%s1358_s1 + $0x58] sm:$0xff]   ;;  %v1184_v31 = vshrl.u32 %v510_v29, 7  ;;  %p927_p12 = pnand %p926_p11, %p1080_p5 }
  0x18   : > { %398 = vmatprep.subr.bf16.mxu0 %v1017_v1  ;;  %819 = vmatprep.subr.bf16.mxu1 %v1017_v1  ;;  %v903_v5 = vld [vmem:[%s1112_s9 + $0x4] ss:$8 sps:$4 sm:$0xff]   ;;  %v898_v12 = vld [vmem:[%s1358_s1 + $0x50] sm:$0xff]   ;;  %v901_v15 = vld [vmem:[%s1112_s9] ss:$8 sps:$4 sm:$0xff]   ;;  %s931_s30 = scalar_lea.vmem %s930_s29, 4096  ;;  %p932_p0 = scmp.lt.s32.totalorder %s1263_s19, %s930_s29 }
  0x19   : > { %v909_v7 = vld [vmem:[%s1112_s9 + $0x44] ss:$8 sps:$4 sm:$0xff]   ;;  %800 = vmatprep.mubr.msk.bf16.mxu0 %vm371_vm0, %v903_v5  ;;  %v907_v16 = vld [vmem:[%s1112_s9 + $0x40] ss:$8 sps:$4 sm:$0xff]   ;;  %v904_v17 = vld [vmem:[%s1112_s9 + $0x14] ss:$8 sps:$4 sm:$0xff]   ;;  %p928_p13 = pneg %p927_p12  ;;  %p933_p1 = scmp.lt.s32.totalorder %s931_s30, %s925_s27 }
  0x1a   : > { %804 = vmatprep.mubr.msk.bf16.mxu1 %vm371_vm0, %v909_v7  ;;  %v899_v13 = vld [vmem:[%s1358_s1 + $0x48] sm:$0xff]   ;;  %v900_v14 = vld [vmem:[%s1358_s1 + $0x40] sm:$0xff]   ;;  %v913_v18 = vld [vmem:[%s1112_s9 + $0x54] ss:$8 sps:$4 sm:$0xff]   ;;  %v512_v34 = vadd.s32 8, %v1184_v31  ;;  %v513_v37 = vadd.s32 16, %v1184_v31 }
  0x1b   : > { %399 = vmatpush1.bf16.msra.mxu0 %v890_v2  ;;  %831 = vmatpush1.bf16.msra.mxu1 %v890_v2  ;;  %v906_v19 = vld [vmem:[%s1112_s9 + $0x10] ss:$8 sps:$4 sm:$0xff]   ;;  %v910_v21 = vld [vmem:[%s1112_s9 + $0x24] ss:$8 sps:$4 sm:$0xff]   ;;  %v912_v23 = vld [vmem:[%s1112_s9 + $0x20] ss:$8 sps:$4 sm:$0xff]   ;;  %p934_p2 = por %p933_p1, %p932_p0 }
  0x1c   : > { %400 = vmatprep.subr.bf16.mxu0 %v1017_v1  ;;  %820 = vmatprep.subr.bf16.mxu1 %v1017_v1  ;;  %v915_v20 = vld [vmem:[%s1112_s9 + $0x50] ss:$8 sps:$4 sm:$0xff]   ;;  %v919_v22 = vld [vmem:[%s1112_s9 + $0x64] ss:$8 sps:$4 sm:$0xff]   ;;  %v921_v24 = vld [vmem:[%s1112_s9 + $0x60] ss:$8 sps:$4 sm:$0xff]  }
  0x1d   : > { %v916_v25 = vld [vmem:[%s1112_s9 + $0x34] ss:$8 sps:$4 sm:$0xff]   ;;  %v918_v27 = vld [vmem:[%s1112_s9 + $0x30] ss:$8 sps:$4 sm:$0xff]   ;;  %v514_v42 = vadd.s32 24, %v1184_v31  ;;  %v515_v47 = vadd.s32 32, %v1184_v31  ;;  %p935_p3 = pnand %p934_p2, %p928_p13 }
  0x1e   : > { %v922_v26 = vld [vmem:[%s1112_s9 + $0x74] ss:$8 sps:$4 sm:$0xff]   ;;  %v924_v28 = vld [vmem:[%s1112_s9 + $0x70] ss:$8 sps:$4 sm:$0xff]   ;;  %s808_s9 = sshll.u32 %s1063_s16, 7  ;;  %v516_v49 = vadd.s32 40, %v1184_v31 }
  0x1f   : > { %401 = vmatpush1.bf16.msra.mxu0 %v891_v3  ;;  %832 = vmatpush1.bf16.msra.mxu1 %v891_v3  ;;  %v1198_v39 = vstv %s808_s9  ;;  %v517_v58 = vadd.s32 48, %v1184_v31  ;;  %v519_v2 = vadd.s32 64, %v1184_v31 }
  0x20   : > { %402 = vmatprep.subr.bf16.mxu0 %v1017_v1  ;;  %821 = vmatprep.subr.bf16.mxu1 %v1017_v1  ;;  %v529_v40 = vadd.s32 %v1198_v39, %v512_v34  ;;  %v528_v44 = vadd.s32 %v1198_v39, %v1184_v31  ;;  %v530_v46 = vadd.s32 %v1198_v39, %v513_v37 }
  0x21   : > { %v531_v51 = vadd.s32 %v1198_v39, %v514_v42  ;;  %v532_v54 = vadd.s32 %v1198_v39, %v515_v47  ;;  %v533_v57 = vadd.s32 %v1198_v39, %v516_v49  ;;  %v524_v47 = vadd.s32 104, %v1184_v31 }
  0x22   : > { %vm545_vm1 = vcmp.lt.s32.totalorder %v529_v40, 256  ;;  %vm544_vm2 = vcmp.lt.s32.totalorder %v528_v44, 256  ;;  %vm546_vm3 = vcmp.lt.s32.totalorder %v530_v46, 256  ;;  %v523_v40 = vadd.s32 96, %v1184_v31 }
  0x23   : > { %403 = vmatpush1.bf16.msra.mxu0 %v892_v4  ;;  %833 = vmatpush1.bf16.msra.mxu1 %v892_v4  ;;  %vm547_vm4 = vcmp.lt.s32.totalorder %v531_v51, 256  ;;  %vm548_vm5 = vcmp.lt.s32.totalorder %v532_v54, 256  ;;  %vm549_vm6 = vcmp.lt.s32.totalorder %v533_v57, 256  ;;  %v534_v4 = vadd.s32 %v1198_v39, %v517_v58 }
  0x24   : > { %404 = vmatprep.subr.bf16.mxu0 %v1017_v1  ;;  %822 = vmatprep.subr.bf16.mxu1 %v1017_v1  ;;  %v540_v54 = vadd.s32 %v1198_v39, %v523_v40 }
  0x25   : > { %vm550_vm7 = vcmp.lt.s32.totalorder %v534_v4, 256 }
  0x27   : > { %405 = vmatpush1.bf16.msra.mxu0 %v893_v6  ;;  %834 = vmatpush1.bf16.msra.mxu1 %v893_v6 }
  0x28   : > { %406 = vmatprep.subr.bf16.mxu0 %v1017_v1  ;;  %823 = vmatprep.subr.bf16.mxu1 %v1017_v1 }
  0x2b   : > { %407 = vmatpush1.bf16.msra.mxu0 %v894_v8  ;;  %835 = vmatpush1.bf16.msra.mxu1 %v894_v8 }
  0x2c   : > { %408 = vmatprep.subr.bf16.mxu0 %v1017_v1  ;;  %824 = vmatprep.subr.bf16.mxu1 %v1017_v1 }
  0x2f   : > { %409 = vmatpush1.bf16.msra.mxu0 %v895_v9  ;;  %836 = vmatpush1.bf16.msra.mxu1 %v895_v9  ;;  %v518_v9 = vadd.s32 56, %v1184_v31 }
  0x30   : > { %410 = vmatprep.subr.bf16.mxu0 %v1017_v1  ;;  %825 = vmatprep.subr.bf16.mxu1 %v1017_v1 }
  0x33   : > { %411 = vmatpush1.bf16.msra.mxu0 %v896_v10  ;;  %837 = vmatpush1.bf16.msra.mxu1 %v896_v10 }
  0x34   : > { %420 = vmatprep.subr.bf16.mxu0 %v1017_v1  ;;  %826 = vmatprep.subr.bf16.mxu1 %v1017_v1 }
  0x37   : > { %421 = vmatpush2.bf16.msra.mxu0 %v897_v11  ;;  %838 = vmatpush2.bf16.msra.mxu1 %v897_v11 }
  0x38   : > { %422 = vmatprep.subr.bf16.mxu0 %v1017_v1  ;;  %827 = vmatprep.subr.bf16.mxu1 %v1017_v1 }
  0x3b   : > { %423 = vmatpush2.bf16.msra.mxu0 %v898_v12  ;;  %839 = vmatpush2.bf16.msra.mxu1 %v898_v12 }
  0x3c   : > { %424 = vmatprep.subr.bf16.mxu0 %v1017_v1  ;;  %828 = vmatprep.subr.bf16.mxu1 %v1017_v1 }
  0x3f   : > { %425 = vmatpush2.bf16.msra.mxu0 %v899_v13  ;;  %840 = vmatpush2.bf16.msra.mxu1 %v899_v13 }
  0x40   : > { %426 = vmatprep.subr.bf16.mxu0 %v1017_v1  ;;  %829 = vmatprep.subr.bf16.mxu1 %v1017_v1 }
  0x43   : > { %427 = vmatpush2.bf16.msra.mxu0 %v900_v14  ;;  %841 = vmatpush2.bf16.msra.mxu1 %v900_v14 }
  0x46   : > { %429 = vmatmul.mubr.bf16.vlgmr.msra.gmra.mxu0 %v901_v15  ;;  %461 = vmatmul.mubr.bf16.vlgmr.msra.gmra.mxu1 %v907_v16  ;;  %v520_v15 = vadd.s32 72, %v1184_v31 }
  0x47   : > { %801 = vmatprep.mubr.msk.bf16.mxu0 %vm371_vm0, %v904_v17  ;;  %805 = vmatprep.mubr.msk.bf16.mxu1 %vm371_vm0, %v913_v18  ;;  %v536_v18 = vadd.s32 %v1198_v39, %v519_v2 }
  0x48   : > { %v1246_v29 = vadd.s32 %v1198_v39, %v520_v15 }
  0x49   : > { %vm552_vm8 = vcmp.lt.s32.totalorder %v536_v18, 256 }
  0x4a   : > { %vm553_vm10 = vcmp.lt.s32.totalorder %v1246_v29, 256 }
  0x4e   : > { %437 = vmatmul.mubr.bf16.gmra.mxu0 %v906_v19  ;;  %469 = vmatmul.mubr.bf16.gmra.mxu1 %v915_v20  ;;  %v521_v19 = vadd.s32 80, %v1184_v31 }
  0x4f   : > { %802 = vmatprep.mubr.msk.bf16.mxu0 %vm371_vm0, %v910_v21  ;;  %806 = vmatprep.mubr.msk.bf16.mxu1 %vm371_vm0, %v919_v22 }
  0x56   : > { %445 = vmatmul.mubr.bf16.gmra.mxu0 %v912_v23  ;;  %477 = vmatmul.mubr.bf16.gmra.mxu1 %v921_v24 }
  0x57   : > { %803 = vmatprep.mubr.msk.bf16.mxu0 %vm371_vm0, %v916_v25  ;;  %807 = vmatprep.mubr.msk.bf16.mxu1 %vm371_vm0, %v922_v26  ;;  %v535_v25 = vadd.s32 %v1198_v39, %v518_v9 }
  0x59   : > { %vm551_vm9 = vcmp.lt.s32.totalorder %v535_v25, 256 }
  0x5e   : > { %453 = vmatmul.mubr.bf16.gmra.mxu0 %v918_v27  ;;  %485 = vmatmul.mubr.bf16.gmra.mxu1 %v924_v28  ;;  %v522_v27 = vadd.s32 88, %v1184_v31 }
  0x60   : > { %v539_v46 = vadd.s32 %v1198_v39, %v522_v27 }
 0x106   : > { %v430_v30 = vpop.f32.mrf.mxu0  ;;  %v1186_v32 = vpop.f32.mrf.mxu1 }
 0x107   : > { %493 = vst [vmem:[%s1188_s11] sm:$0xff] %v430_v30  ;;  %501 = vst [vmem:[%s1188_s11 + $0x40] sm:$0xff] %v1186_v32  ;;  %v560_v61 = vsel %vm544_vm2, %v430_v30, 0.0 }
 0x108   : > { %v432_v33 = vpop.f32.mrf.mxu0  ;;  %v464_v35 = vpop.f32.mrf.mxu1  ;;  %v597_v5 = vmul.f32 %v560_v61, %v560_v61 }
 0x10a   : > { %v433_v36 = vpop.f32.mrf.mxu0  ;;  %v1196_v38 = vpop.f32.mrf.mxu1 }
 0x10b   : > { %494 = vst [vmem:[%s1188_s11 + $0x8] sm:$0xff] %v433_v36  ;;  %502 = vst [vmem:[%s1188_s11 + $0x48] sm:$0xff] %v1196_v38  ;;  %v561_v56 = vsel %vm545_vm1, %v433_v36, 0.0  ;;  %v1251_v36 = vadd.s32 %v1198_v39, %v521_v19 }
 0x10c   : > { %v435_v41 = vpop.f32.mrf.mxu0  ;;  %v467_v43 = vpop.f32.mrf.mxu1  ;;  %v598_v63 = vmul.f32 %v561_v56, %v561_v56  ;;  %v576_v6 = vadd.f32 %v561_v56, %v560_v61  ;;  %v525_v61 = vadd.s32 112, %v1184_v31 }
 0x10d   : > { %vm554_vm11 = vcmp.lt.s32.totalorder %v1251_v36, 256 }
 0x10e   : > { %v438_v45 = vpop.f32.mrf.mxu0  ;;  %v1209_v48 = vpop.f32.mrf.mxu1  ;;  %v613_v12 = vadd.f32 %v598_v63, %v597_v5 }
 0x10f   : > { %495 = vst [vmem:[%s1188_s11 + $0x10] sm:$0xff] %v438_v45  ;;  %503 = vst [vmem:[%s1188_s11 + $0x50] sm:$0xff] %v1209_v48  ;;  %v562_v62 = vsel %vm546_vm3, %v438_v45, 0.0 }
 0x110   : > { %v440_v50 = vpop.f32.mrf.mxu0  ;;  %v472_v52 = vpop.f32.mrf.mxu1  ;;  %v599_v7 = vmul.f32 %v562_v62, %v562_v62  ;;  %v577_v13 = vadd.f32 %v576_v6, %v562_v62 }
 0x112   : > { %v441_v53 = vpop.f32.mrf.mxu0  ;;  %v1217_v55 = vpop.f32.mrf.mxu1  ;;  %v614_v21 = vadd.f32 %v613_v12, %v599_v7 }
 0x113   : > { %496 = vst [vmem:[%s1188_s11 + $0x18] sm:$0xff] %v441_v53  ;;  %504 = vst [vmem:[%s1188_s11 + $0x58] sm:$0xff] %v1217_v55  ;;  %v563_v3 = vsel %vm547_vm4, %v441_v53, 0.0  ;;  %v568_v53 = vsel %vm552_vm8, %v1186_v32, 0.0 }
 0x114   : > { %v443_v59 = vpop.f32.mrf.mxu0  ;;  %v475_v60 = vpop.f32.mrf.mxu1  ;;  %v600_v14 = vmul.f32 %v563_v3, %v563_v3  ;;  %v578_v22 = vadd.f32 %v577_v13, %v563_v3 }
 0x116   : > { %v446_v0 = vpop.f32.mrf.mxu0  ;;  %v1224_v1 = vpop.f32.mrf.mxu1  ;;  %v615_v28 = vadd.f32 %v614_v21, %v600_v14 }
 0x117   : > { %497 = vst [vmem:[%s1188_s11 + $0x20] sm:$0xff] %v446_v0  ;;  %505 = vst [vmem:[%s1188_s11 + $0x60] sm:$0xff] %v1224_v1  ;;  %v564_v11 = vsel %vm548_vm5, %v446_v0, 0.0 }
 0x118   : > { %v448_v8 = vpop.f32.mrf.mxu0  ;;  %v480_v10 = vpop.f32.mrf.mxu1  ;;  %v601_v23 = vmul.f32 %v564_v11, %v564_v11  ;;  %v579_v30 = vadd.f32 %v578_v22, %v564_v11 }
 0x11a   : > { %v449_v16 = vpop.f32.mrf.mxu0  ;;  %v1233_v17 = vpop.f32.mrf.mxu1  ;;  %v616_v41 = vadd.f32 %v615_v28, %v601_v23 }
 0x11b   : > { %498 = vst [vmem:[%s1188_s11 + $0x28] sm:$0xff] %v449_v16  ;;  %v565_v20 = vsel %vm549_vm6, %v449_v16, 0.0  ;;  %506 = vst [vmem:[%s1188_s11 + $0x68] sm:$0xff] %v1233_v17 }
 0x11c   : > { %v451_v24 = vpop.f32.mrf.mxu0  ;;  %v483_v26 = vpop.f32.mrf.mxu1  ;;  %v602_v33 = vmul.f32 %v565_v20, %v565_v20  ;;  %v580_v42 = vadd.f32 %v579_v30, %v565_v20 }
 0x11e   : > { %v454_v34 = vpop.f32.mrf.mxu0  ;;  %v1248_v35 = vpop.f32.mrf.mxu1  ;;  %v617_v49 = vadd.f32 %v616_v41, %v602_v33 }
 0x11f   : > { %499 = vst [vmem:[%s1188_s11 + $0x30] sm:$0xff] %v454_v34  ;;  %v566_v37 = vsel %vm550_vm7, %v454_v34, 0.0  ;;  %507 = vst [vmem:[%s1188_s11 + $0x70] sm:$0xff] %v1248_v35 }
 0x120   : > { %v603_v43 = vmul.f32 %v566_v37, %v566_v37  ;;  %v456_v44 = vpop.f32.mrf.mxu0  ;;  %v488_v45 = vpop.f32.mrf.mxu1  ;;  %v581_v50 = vadd.f32 %v580_v42, %v566_v37 }
 0x122   : > { %v457_v51 = vpop.f32.mrf.mxu0  ;;  %v1268_v52 = vpop.f32.mrf.mxu1  ;;  %v618_v57 = vadd.f32 %v617_v49, %v603_v43 }
 0x123   : > { %500 = vst [vmem:[%s1188_s11 + $0x38] sm:$0xff] %v457_v51  ;;  %v567_v56 = vsel %vm551_vm9, %v457_v51, 0.0  ;;  %508 = vst [vmem:[%s1188_s11 + $0x78] sm:$0xff] %v1268_v52 }
 0x124   : > { %v582_v58 = vadd.f32 %v581_v50, %v567_v56  ;;  %v604_v59 = vmul.f32 %v567_v56, %v567_v56  ;;  %v459_v60 = vpop.f32.mrf.mxu0  ;;  %v491_v62 = vpop.f32.mrf.mxu1 }
 0x125   : > { %938 = shalt.err (!%p935_p3)
}
 0x126   : > { %s939_s4 = scalar_lea.hbm %s1261_s25, 2048  ;;  %s943_s7 = scalar_lea.hbm %s1359_s2, 4096 }
 0x127   : > { %p940_p4 = scmp.ne.s32.totalorder %s1261_s25, %s939_s4  ;;  %p944_p9 = scmp.lt.s32.totalorder %s1261_s25, %s1359_s2 }
 0x128   : > { %p945_p10 = scmp.lt.s32.totalorder %s943_s7, %s939_s4 }
 0x129   : > { %p941_p7 = pnand %p940_p4, %p1080_p5 }
 0x12a   : > { %p946_p11 = por %p945_p10, %p944_p9 }
 0x12b   : > { %p942_p8 = pneg %p941_p7 }
 0x12d   : > { %p947_p12 = pnand %p946_p11, %p942_p8 }
 0x12f   : > { %950 = shalt.err (!%p947_p12)
}
 0x130   : > { %s1019_s9 = smov 128   ;;  %s1020_s17 = smov 8   ;;  %v569_v32 = vsel %vm553_vm10, %v1196_v38, 0.0  ;;  %vm555_vm12 = vcmp.lt.s32.totalorder %v539_v46, 256  ;;  %v541_v63 = vadd.s32 %v1198_v39, %v524_v47  ;;  %v605_v0 = vmul.f32 %v568_v53, %v568_v53 }
 0x131   : > { %842 = dma.vmem_to_hbm [thread:$0]  (%p1080_p5), %s1263_s19, 2048, %s1261_s25, %s638_s26, %s1019_s9, %s1019_s9, %s1020_s17   ;;  %v583_v2 = vadd.f32 %v582_v58, %v568_v53  ;;  %v619_v3 = vadd.f32 %v618_v57, %v604_v59  ;;  %v526_v4 = vadd.s32 120, %v1184_v31  ;;  %v570_v5 = vsel %vm554_vm11, %v1209_v48, 0.0 }
 0x132   : > { %vm556_vm13 = vcmp.lt.s32.totalorder %v540_v54, 256  ;;  %v606_v6 = vmul.f32 %v569_v32, %v569_v32  ;;  %v542_v9 = vadd.s32 %v1198_v39, %v525_v61  ;;  %v571_v38 = vsel %vm555_vm12, %v1217_v55, 0.0  ;;  %s768_s19 = sshll.u32 %s1181_s8, 1  ;;  %s813_s20 = sshll.u32 %s1063_s16, 5 }
 0x133   : > { %v584_v7 = vadd.f32 %v583_v2, %v569_v32  ;;  %v620_v8 = vadd.f32 %v619_v3, %v605_v0  ;;  %vm557_vm14 = vcmp.lt.s32.totalorder %v541_v63, 256  ;;  %v607_v10 = vmul.f32 %v570_v5, %v570_v5  ;;  %s177_s24 = scalar_lea.vmem [#allocation4], %s768_s19  ;;  %s1321_s28 = scalar_lea.hbm %s1360_s3, %s813_s20 }
 0x134   : > { %v543_v13 = vadd.s32 %v1198_v39, %v526_v4  ;;  %v572_v31 = vsel %vm556_vm13, %v1224_v1, 0.0  ;;  %v608_v14 = vmul.f32 %v571_v38, %v571_v38  ;;  %vm558_vm15 = vcmp.lt.s32.totalorder %v542_v9, 256  ;;  %s672_s25 = sshll.u32 %s177_s24, 4  ;;  %s643_s29 = scalar_lea.sflag [#allocation5], %s1181_s8  ;;  %s673_s25 = int_to_ptr.vmem [resolvable:$true] %s672_s25 }
 0x135   : > { %v621_v11 = vadd.f32 %v620_v8, %v606_v6  ;;  %v585_v12 = vadd.f32 %v584_v7, %v570_v5  ;;  %v573_v48 = vsel %vm557_vm14, %v1233_v17, 0.0  ;;  %v609_v18 = vmul.f32 %v572_v31, %v572_v31  ;;  %s951_s30 = scalar_lea.vmem %s673_s25, 32  ;;  %s1021_s16 = smov [#allocation4]  }
 0x136   : > { %vm559_vm0 = vcmp.lt.s32.totalorder %v543_v13, 256  ;;  %v574_v55 = vsel %vm558_vm15, %v1248_v35, 0.0  ;;  %v610_v22 = vmul.f32 %v573_v48, %v573_v48  ;;  %vm634_vm1 = vcmask 1040384   ;;  %p952_p13 = scmp.ne.s32.totalorder %s673_s25, %s951_s30  ;;  %s955_s4 = sshll.u32 %s1021_s16, 4  ;;  %s956_s4 = int_to_ptr.vmem [resolvable:$false] %s955_s4 }
 0x137   : > { %v586_v15 = vadd.f32 %v585_v12, %v571_v38  ;;  %v622_v16 = vadd.f32 %v621_v11, %v607_v10  ;;  %v575_v39 = vsel %vm559_vm0, %v1268_v52, 0.0  ;;  %v611_v25 = vmul.f32 %v574_v55, %v574_v55  ;;  %s957_s5 = scalar_lea.vmem %s956_s4, 64  ;;  %p958_p2 = scmp.lt.s32.totalorder %s673_s25, %s956_s4 }
 0x138   : > { %v612_v28 = vmul.f32 %v575_v39, %v575_v39  ;;  %p953_p0 = pnand %p952_p13, %p1080_p5  ;;  %p959_p3 = scmp.lt.s32.totalorder %s957_s5, %s951_s30 }
 0x139   : > { %v587_v19 = vadd.f32 %v586_v15, %v572_v31  ;;  %v623_v20 = vadd.f32 %v622_v16, %v608_v14 }
 0x13a   : > { %p954_p1 = pneg %p953_p0  ;;  %p960_p4 = por %p959_p3, %p958_p2 }
 0x13b   : > { %v588_v21 = vadd.f32 %v587_v19, %v573_v48  ;;  %v624_v23 = vadd.f32 %v623_v20, %v609_v18 }
 0x13c   : > { %p961_p7 = pnand %p960_p4, %p954_p1 }
 0x13d   : > { %v625_v24 = vadd.f32 %v624_v23, %v610_v22  ;;  %v589_v1 = vadd.f32 %v588_v21, %v574_v55 }
 0x13f   : > { %v626_v26 = vadd.f32 %v625_v24, %v611_v25  ;;  %v590_v27 = vadd.f32 %v589_v1, %v575_v39 }
 0x141   : > { %v591_v17 = vrot.slane %v590_v27, 4  ;;  %v627_v29 = vadd.f32 %v626_v26, %v612_v28 }
 0x143   : > { %v592_v30 = vadd.f32 %v591_v17, %v590_v27  ;;  %v628_v33 = vrot.slane %v627_v29, 4 }
 0x145   : > { %v593_v34 = vrot.slane %v592_v30, 2  ;;  %v629_v36 = vadd.f32 %v628_v33, %v627_v29 }
 0x147   : > { %v594_v35 = vadd.f32 %v593_v34, %v592_v30  ;;  %v630_v37 = vrot.slane %v629_v36, 2 }
 0x149   : > { %v595_v40 = vrot.slane %v594_v35, 1  ;;  %v631_v41 = vadd.f32 %v630_v37, %v629_v36 }
 0x14b   : > { %v632_v42 = vrot.slane %v631_v41, 1  ;;  %v596_v43 = vadd.f32 %v595_v40, %v594_v35 }
 0x14d   : > { %v633_v44 = vadd.f32 %v632_v42, %v631_v41 }
 0x14f   : > { %v635_v45 = vsel %vm634_vm1, %v596_v43, %v633_v44 }
 0x150   : > { %636 = vst [vmem:[%s177_s24] sm:$0x3] %v635_v45 }
 0x151   : > { %964 = shalt.err (!%p961_p7)
}
 0x152   : > { %s965_s6 = scalar_lea.hbm %s1321_s28, 32  ;;  %s969_s10 = scalar_lea.hbm %s1360_s3, 64 }
 0x153   : > { %p966_p8 = scmp.ne.s32.totalorder %s1321_s28, %s965_s6  ;;  %p970_p11 = scmp.lt.s32.totalorder %s1321_s28, %s1360_s3 }
 0x154   : > { %p971_p12 = scmp.lt.s32.totalorder %s969_s10, %s965_s6 }
 0x155   : > { %p967_p9 = pnand %p966_p8, %p1080_p5 }
 0x156   : > { %p972_p13 = por %p971_p12, %p970_p11 }
 0x157   : > { %p968_p10 = pneg %p967_p9 }
 0x159   : > { %p973_p0 = pnand %p972_p13, %p968_p10 }
 0x15b   : > { %976 = shalt.err (!%p973_p0)
}
 0x15c   : > { %843 = dma.vmem_to_hbm [thread:$0]  (%p1080_p5), %s673_s25, 32, %s1321_s28, %s643_s29  }
 0x15d PF: > { %p853_p1 = scmp.ge.s32.totalorder %s1015_s15, 2  ;;  %s684_s17 = sand.u32 1, %s1003_s12  }
 0x15e   : > { %s685_s19 = scalar_lea.sflag [#allocation3], %s684_s17 }
 0x15f   : > { %p847_p2 = pnand %p853_p1, %p1084_p6 }
 0x161   : > { %p848_p3 = pneg %p847_p2 }
 0x163   : > { %994 = dma.done.wait (%p848_p3), %s685_s19, 2048  }
 0x164   : > { %996 = vsyncadd (%p848_p3), %s685_s19, 4294965248  ;;  %s694_s20 = scalar_lea.sflag [#allocation5], %s684_s17 }
 0x165   : > { %998 = dma.done.wait (%p848_p3), %s694_s20, 32  }
 0x166   : > { %1000 = vsyncadd (%p848_p3), %s694_s20, 4294967264  ;;  %p17_p5 = scmp.ge.s32.totalorder %s1067_s18, 4   ;;  %s1363_s12 = smov %s1007_s13 }
 0x167   : > { %s1364_s13 = smov %s1011_s14  ;;  %s1365_s14 = smov %s1078_s21 }
 0x168   : > { %s1366_s15 = smov %s1067_s18  ;;  %19 = sbr.rel (!%p17_p5) target bundleno = 5 (0x5), region = 80 }
 0x16d   :  { %699 = vsyncpa [#allocation3], 1 }
 0x16e   :  { %701 = vsyncpa [#allocation3 + $0x1], 1 }
 0x16f   :  { %702 = vsyncpa [#allocation5], 1 }
 0x170   :  { %704 = vsyncpa [#allocation5 + $0x1], 1 }

</bundles_post_ra>
